<compile_context>
chip_gen: v7x
topology: tpu7x:2x2x1
jax: 0.10.0
libtpu: 0.0.40
codegen_flags: <defaults>
</compile_context>

<pallas_src>
import functools

import jax
import jax.numpy as jnp
from jax.experimental import pallas as pl
from jax.experimental.pallas import tpu as pltpu


# ------------------------------------------------------------------ kernels --
def _addmm_small_kernel(a_ref, b_ref, bias_ref, out_ref, *, cast_bf16):
    # Whole problem in one block: single MXU push + VPU bias add.
    a = a_ref[...]
    b = b_ref[...]
    if cast_bf16:
        a = a.astype(jnp.bfloat16)
        b = b.astype(jnp.bfloat16)
    acc = jnp.dot(a, b, preferred_element_type=jnp.float32)
    out_ref[...] = (acc + bias_ref[...]).astype(out_ref.dtype)


def _addmm_tiled_kernel(a_ref, b_ref, bias_ref, out_ref, acc_ref, *, cast_bf16):
    k = pl.program_id(2)

    @pl.when(k == 0)
    def _():
        # Seed the accumulator with the bias: saves a zero-fill and the
        # epilogue add.  The bias block index depends only on (i, j), so the
        # tile is resident across the whole K reduction.
        acc_ref[...] = bias_ref[...].astype(jnp.float32)

    a = a_ref[...]
    b = b_ref[...]
    if cast_bf16:
        a = a.astype(jnp.bfloat16)
        b = b.astype(jnp.bfloat16)
    acc_ref[...] += jnp.dot(a, b, preferred_element_type=jnp.float32)

    @pl.when(k == pl.num_programs(2) - 1)
    def _():
        out_ref[...] = acc_ref[...].astype(out_ref.dtype)


# ------------------------------------------------------------------ helpers --
def _round_up(x, m):
    return (x + m - 1) // m * m


def _pick_tile(dim, max_tile, align):
    """Largest divisor of `dim` that is a multiple of `align` and <= max_tile.

    `dim` is already a multiple of `align`, so `align` always works as a
    fallback.  This avoids padding beyond the hardware-minimum alignment.
    """
    if dim <= max_tile:
        return dim
    t = (min(max_tile, dim) // align) * align
    while t >= align:
        if dim % t == 0:
            return t
        t -= align
    return align


# ----------------------------------------------------------------- wrappers --
def _addmm_small(inp, x1, x2, out_dtype, cast_bf16):
    M, K = inp.shape
    _, N = x1.shape
    in_bytes = (inp.size * inp.dtype.itemsize + x1.size * x1.dtype.itemsize
                + x2.size * x2.dtype.itemsize)
    out_bytes = M * N * jnp.dtype(out_dtype).itemsize
    vmem_limit = int(min(64 << 20, max(32 << 20, 2 * (in_bytes + out_bytes))))
    # No grid, no BlockSpecs: whole arrays land in VMEM, one DMA in / one out.
    return pl.pallas_call(
        functools.partial(_addmm_small_kernel, cast_bf16=cast_bf16),
        out_shape=jax.ShapeDtypeStruct((M, N), out_dtype),
        compiler_params=pltpu.CompilerParams(vmem_limit_bytes=vmem_limit),
        cost_estimate=pl.CostEstimate(
            flops=2 * M * N * K + M * N,
            transcendentals=0,
            bytes_accessed=in_bytes + out_bytes,
        ),
    )(inp, x1, x2)


def _addmm_tiled(inp, x1, x2, tm, tn, tk, out_dtype, cast_bf16):
    M, K = inp.shape
    _, N = x1.shape

    in_item = jnp.dtype(inp.dtype).itemsize
    bias_item = jnp.dtype(x2.dtype).itemsize
    out_item = jnp.dtype(out_dtype).itemsize

    # M alignment: 8 for 32-bit dtypes, 16 for bf16, 32 for 8-bit.
    m_align = max(8, 32 // min(in_item, out_item))

    # Pad only to the hardware minimum.
    Mp = _round_up(M, m_align)
    Kp = _round_up(K, 128)
    Np = _round_up(N, 128)

    # Tiles = exact divisors of the (minimally) padded dims -> zero extra work.
    tm = _pick_tile(Mp, tm, m_align)
    tn = _pick_tile(Np, tn, 128)
    tk = _pick_tile(Kp, tk, 128)

    # Keep >= 2 parallel (i, j) output blocks so both v7x TensorCores are fed.
    if (Mp // tm) * (Np // tn) < 2:
        cand = []
        tm2 = _pick_tile(Mp, max((Mp // 2 // m_align) * m_align, m_align), m_align)
        if Mp // tm2 >= 2:
            cand.append(("m", tm2, Mp // tm2))
        tn2 = _pick_tile(Np, max((Np // 2 // 128) * 128, 128), 128)
        if Np // tn2 >= 2:
            cand.append(("n", tn2, Np // tn2))
        if cand:
            which, t, _ = min(cand, key=lambda c: c[2])  # fewest blocks wins
            if which == "m":
                tm = t
            else:
                tn = t

    # Minimal padding (<= 7 rows / 127 cols) only when dims are ragged.
    a = inp if (Mp, Kp) == (M, K) else jnp.pad(inp, ((0, Mp - M), (0, Kp - K)))
    b = x1 if (Kp, Np) == (K, N) else jnp.pad(x1, ((0, Kp - K), (0, Np - N)))
    c = x2 if (Mp, Np) == (M, N) else jnp.pad(x2, ((0, Mp - M), (0, Np - N)))

    grid = (Mp // tm, Np // tn, Kp // tk)  # reduction axis (k) last

    # VMEM budget derived from the actual tile working set (double-buffered
    # A/B/bias/out + f32 accumulator), capped at 64 MiB for v7x.
    work = (2 * (tm * tk * in_item + tk * tn * in_item + tm * tn * bias_item)
            + 2 * tm * tn * out_item + tm * tn * 4)
    vmem_limit = int(min(64 << 20, max(32 << 20, work + (8 << 20))))

    bytes_accessed = (Mp * Kp * in_item + Kp * Np * in_item
                      + Mp * Np * bias_item + Mp * Np * out_item)

    out = pl.pallas_call(
        functools.partial(_addmm_tiled_kernel, cast_bf16=cast_bf16),
        out_shape=jax.ShapeDtypeStruct((Mp, Np), out_dtype),
        grid=grid,
        in_specs=[
            pl.BlockSpec((tm, tk), lambda i, j, k: (i, k)),
            pl.BlockSpec((tk, tn), lambda i, j, k: (k, j)),
            pl.BlockSpec((tm, tn), lambda i, j, k: (i, j)),   # bias: (i, j) only
        ],
        out_specs=pl.BlockSpec((tm, tn), lambda i, j, k: (i, j)),
        scratch_shapes=[pltpu.VMEM((tm, tn), jnp.float32)],
        compiler_params=pltpu.CompilerParams(
            dimension_semantics=("parallel", "parallel", "arbitrary"),
            vmem_limit_bytes=vmem_limit,
        ),
        cost_estimate=pl.CostEstimate(
            flops=2 * Mp * Np * Kp + Mp * Np,
            transcendentals=0,
            bytes_accessed=bytes_accessed,
        ),
    )(a, b, c)

    if (Mp, Np) != (M, N):
        out = out[:M, :N]
    return out


@functools.partial(jax.jit, static_argnames=("tm", "tn", "tk", "force_tiled",
                                              "out_dtype", "use_bf16_matmul"))
def addmm(inp, x1, x2, *, tm=512, tn=512, tk=1024, force_tiled=False,
          out_dtype=None, use_bf16_matmul=False):
    """Compute inp @ x1 + x2 (torch.addmm) with Pallas TPU kernels."""
    M, K = inp.shape
    K2, N = x1.shape
    assert K == K2, "inner dims must match"
    assert x2.shape == (M, N), "x2 must be (M, N)"
    out_dtype = out_dtype if out_dtype is not None else inp.dtype

    # TODO(synk): for the literal 8x32x128 benchmark shape this is launch-
    # overhead bound; in production fuse this addmm into the adjacent kernel.
    total_bytes = (inp.size * inp.dtype.itemsize + x1.size * x1.dtype.itemsize
                   + x2.size * x2.dtype.itemsize)
    if not force_tiled and total_bytes <= (12 << 20):
        return _addmm_small(inp, x1, x2, out_dtype, use_bf16_matmul)
    return _addmm_tiled(inp, x1, x2, tm, tn, tk, out_dtype, use_bf16_matmul)


# --------------------------------------------------------------------- main --
if __name__ == "__main__":
    key = jax.random.PRNGKey(0)
    k1, k2, k3, k4, k5, k6 = jax.random.split(key, 6)

    # 1) Small shape consistent with the module (single full-extent block).
    M, K, N = 8, 32, 128
    inp = jax.random.normal(k1, (M, K), dtype=jnp.float32)
    x1 = jax.random.normal(k2, (K, N), dtype=jnp.float32)
    x2 = jax.random.normal(k3, (M, N), dtype=jnp.float32)

    out = addmm(inp, x1, x2)
    jax.block_until_ready(out)
    ref = inp @ x1 + x2
    err = jnp.max(jnp.abs(out - ref)) / (jnp.max(jnp.abs(ref)) + 1e-6)
    assert err < 1e-2, f"small-path mismatch, rel-max-err={err}"

    # 2) Exercise the tiled accumulator path (dims already 8/128 aligned ->
    #    runs completely un-padded with divisor tiles).
    M2, K2, N2 = 384, 640, 384
    a = jax.random.normal(k4, (M2, K2), dtype=jnp.float32)
    b = jax.random.normal(k5, (K2, N2), dtype=jnp.float32)
    c = jax.random.normal(k6, (M2, N2), dtype=jnp.float32)

    out2 = addmm(a, b, c, force_tiled=True)
    jax.block_until_ready(out2)
    ref2 = a @ b + c
    err2 = jnp.max(jnp.abs(out2 - ref2)) / (jnp.max(jnp.abs(ref2)) + 1e-6)
    assert err2 < 2e-2, f"tiled-path mismatch, rel-max-err={err2}"

    # 3) Ragged shape (minimal padding path + output slice).
    M3, K3, N3 = 200, 300, 260
    a3 = jax.random.normal(k4, (M3, K3), dtype=jnp.float32)
    b3 = jax.random.normal(k5, (K3, N3), dtype=jnp.float32)
    c3 = jax.random.normal(k6, (M3, N3), dtype=jnp.float32)
    out3 = addmm(a3, b3, c3, force_tiled=True)
    jax.block_until_ready(out3)
    ref3 = a3 @ b3 + c3
    err3 = jnp.max(jnp.abs(out3 - ref3)) / (jnp.max(jnp.abs(ref3)) + 1e-6)
    assert err3 < 2e-2, f"ragged-path mismatch, rel-max-err={err3}"

    print("KERNEL_OK")
</pallas_src>

<mosaic_0001>
module attributes {stable_mosaic.version = 11 : i64} {
  func.func @_addmm_small_kernel(%arg0: memref<8x32xf32, #tpu.memory_space<vmem>>, %arg1: memref<32x128xf32, #tpu.memory_space<vmem>>, %arg2: memref<8x128xf32, #tpu.memory_space<vmem>>, %arg3: memref<8x128xf32, #tpu.memory_space<vmem>>) attributes {dimension_semantics = [], scalar_prefetch = 0 : i64, scratch_operands = 0 : i64, tpu.core_type = #tpu.core_type<tc>} {
    %c0 = arith.constant 0 : index
    %c0_0 = arith.constant 0 : index
    %0 = vector.load %arg0[%c0, %c0_0] : memref<8x32xf32, #tpu.memory_space<vmem>>, vector<8x32xf32>
    %c0_1 = arith.constant 0 : index
    %c0_2 = arith.constant 0 : index
    %1 = vector.load %arg1[%c0_1, %c0_2] : memref<32x128xf32, #tpu.memory_space<vmem>>, vector<32x128xf32>
    %cst = arith.constant dense<0.000000e+00> : vector<8x128xf32>
    %2 = tpu.matmul %0, %1, %cst {dimension_numbers = #tpu.dot_dimension_numbers<[1], [0], [0], [1], [0, 0, 1, 1], [], []>} : vector<8x32xf32>, vector<32x128xf32>, vector<8x128xf32> -> vector<8x128xf32>
    %c0_3 = arith.constant 0 : index
    %c0_4 = arith.constant 0 : index
    %3 = vector.load %arg2[%c0_3, %c0_4] : memref<8x128xf32, #tpu.memory_space<vmem>>, vector<8x128xf32>
    %4 = arith.addf %2, %3 : vector<8x128xf32>
    %c0_5 = arith.constant 0 : index
    %c0_6 = arith.constant 0 : index
    %5 = vector.load %arg3[%c0_5, %c0_6] : memref<8x128xf32, #tpu.memory_space<vmem>>, vector<8x128xf32>
    tpu.vector_store %arg3[%c0_5, %c0_6], %4 {strides = array<i32>} : memref<8x128xf32, #tpu.memory_space<vmem>>, vector<8x128xf32>,
    return
  }
}

</mosaic_0001>

<bundles_post_ra>
// kernel: addmm.1
= control target key start
LH: loop header
LB: loop body
LE: loop exit
PB: predicated region body
PF: predicated region fallthrough
CT: control target
= control target key end

     0   :  { %8 = vsyncpa [#allocation3], 0  ;;  %s352_s0 = inlined_call_operand.hbm [shape: f32[8,32], index: 0, kind: input, shape index: {}]   ;;  %s353_s1 = inlined_call_operand.hbm [shape: f32[32,128], index: 1, kind: input, shape index: {}]   ;;  %s354_s2 = inlined_call_operand.hbm [shape: f32[8,128], index: 2, kind: input, shape index: {}]   ;;  %s355_s3 = inlined_call_operand.hbm [shape: f32[8,128], index: 3, kind: output, shape index: {}]  }
   0x1   :  { %9 = vsyncpa [#allocation6], 0 }
   0x2   :  { %10 = vsyncpa [#allocation4], 0  ;;  %s275_s12 = smov [#allocation5]   ;;  %s181_s16 = scalar_lea.hbm %s353_s1, 512 }
   0x3   :  { %s26_s13 = sshll.u32 %s275_s12, 4  ;;  %p182_p0 = scmp.ne.s32.totalorder %s353_s1, %s181_s16  ;;  %s27_s13 = int_to_ptr.vmem [resolvable:$true] %s26_s13 }
   0x4   :  { %p185_p1 = scmp.lt.u32.totalorder %s181_s16, %s353_s1 }
   0x6   :  { %p187_p2 = pnand %p185_p1, %p182_p0 }
   0x8   :  { %190 = shalt.err (!%p187_p2)
}
   0x9   :  { %s191_s21 = scalar_lea.vmem %s27_s13, 512  ;;  %p196_p4 = scmp.lt.s32.totalorder %s27_s13, %s27_s13 }
   0xa   :  { %p192_p3 = scmp.ne.s32.totalorder %s27_s13, %s191_s21  ;;  %p197_p5 = scmp.lt.s32.totalorder %s191_s21, %s191_s21 }
   0xc   :  { %p198_p6 = por %p197_p5, %p196_p4 }
   0xe   :  { %p199_p7 = pnand %p198_p6, %p192_p3 }
  0x10   :  { %202 = shalt.err (!%p199_p7)
}
  0x11   :  { %s276_s22 = smov 128   ;;  %s277_s23 = smov 8  }
  0x12   :  { %32 = dma.hbm_to_vmem [thread:$0]  %s353_s1, 512, %s27_s13, [#allocation6], %s276_s22, %s276_s22, %s277_s23  }
  0x13   :  { %s278_s26 = smov [#allocation2]   ;;  %s279_s28 = smov [#allocation7]  }
  0x14   :  { %s17_s27 = sshll.u32 %s278_s26, 4  ;;  %s39_s29 = sshll.u32 %s279_s28, 4  ;;  %s18_s27 = int_to_ptr.vmem [resolvable:$true] %s17_s27  ;;  %s40_s29 = int_to_ptr.vmem [resolvable:$true] %s39_s29 }
  0x15   :  { %s203_s5 = scalar_lea.hbm %s352_s0, 128 }
  0x16   :  { %p204_p8 = scmp.ne.s32.totalorder %s352_s0, %s203_s5  ;;  %p207_p9 = scmp.lt.u32.totalorder %s203_s5, %s352_s0 }
  0x18   :  { %p209_p10 = pnand %p207_p9, %p204_p8 }
  0x1a   :  { %212 = shalt.err (!%p209_p10)
}
  0x1b   :  { %s213_s1 = scalar_lea.vmem %s18_s27, 128  ;;  %p218_p12 = scmp.lt.s32.totalorder %s18_s27, %s18_s27 }
  0x1c   :  { %p214_p11 = scmp.ne.s32.totalorder %s18_s27, %s213_s1  ;;  %p219_p13 = scmp.lt.s32.totalorder %s213_s1, %s213_s1 }
  0x1e   :  { %p220_p0 = por %p219_p13, %p218_p12 }
  0x20   :  { %p221_p1 = pnand %p220_p0, %p214_p11 }
  0x22   :  { %224 = shalt.err (!%p221_p1)
}
  0x23   :  { %20 = dma.hbm_to_vmem [thread:$0]  %s352_s0, 128, %s18_s27, [#allocation3]  }
  0x24   :  { %s225_s14 = scalar_lea.hbm %s354_s2, 128 }
  0x25   :  { %p226_p2 = scmp.ne.s32.totalorder %s354_s2, %s225_s14  ;;  %p229_p3 = scmp.lt.u32.totalorder %s225_s14, %s354_s2 }
  0x27   :  { %p231_p4 = pnand %p229_p3, %p226_p2 }
  0x29   :  { %234 = shalt.err (!%p231_p4)
}
  0x2a   :  { %s235_s19 = scalar_lea.vmem %s40_s29, 128  ;;  %p240_p6 = scmp.lt.s32.totalorder %s40_s29, %s40_s29 }
  0x2b   :  { %p236_p5 = scmp.ne.s32.totalorder %s40_s29, %s235_s19  ;;  %p241_p7 = scmp.lt.s32.totalorder %s235_s19, %s235_s19 }
  0x2d   :  { %p242_p8 = por %p241_p7, %p240_p6 }
  0x2f   :  { %p243_p9 = pnand %p242_p8, %p236_p5 }
  0x31   :  { %246 = shalt.err (!%p243_p9)
}
  0x32   :  { %42 = dma.hbm_to_vmem [thread:$0]  %s354_s2, 128, %s40_s29, [#allocation6]  }
  0x33   :  { %269 = dma.done.wait [#allocation3], 128  }
  0x34   :  { %270 = vsyncadd [#allocation3], 4294967168 }
  0x35   :  { %271 = dma.done.wait [#allocation6], 640  }
  0x36   :  { %272 = vsyncadd [#allocation6], 4294966656  ;;  %v280_v0 = vmov 0.0|0.0   ;;  %vm281_vm0 = vmmov 0   ;;  %v282_v1 = vmov 0.0   ;;  %v53_v2 = vld [vmem:[#allocation5] sm:$0xff] }
  0x37   :  { %166 = vmatprep.subr.bf16.mxu0 %v280_v0  ;;  %163 = vmatprep.mubr.msk.f32.mxu0 %vm281_vm0, %v282_v1  ;;  %v54_v3 = vld [vmem:[#allocation5 + $0x8] sm:$0xff]  ;;  %v55_v4 = vld [vmem:[#allocation5 + $0x10] sm:$0xff]  ;;  %v56_v6 = vld [vmem:[#allocation5 + $0x18] sm:$0xff]  ;;  %vm58_vm1 = vcmask 261120   ;;  %s283_s2 = smov [#allocation8]  }
  0x38   :  { %v167_v5 = vpack.c.bf16 %v54_v3, %v53_v2  ;;  %v170_v7 = vpack.c.bf16 %v56_v6, %v55_v4  ;;  %v52_v8 = vld [vmem:[#allocation2] sm:$0xff]  ;;  %v57_v9 = vld [vmem:[#allocation7] sm:$0xff]  ;;  %s139_s21 = sshll.u32 %s283_s2, 4  ;;  %s140_s21 = int_to_ptr.vmem [resolvable:$true] %s139_s21 }
  0x39   :  { %s247_s22 = scalar_lea.vmem %s140_s21, 128  ;;  %p252_p11 = scmp.lt.s32.totalorder %s140_s21, %s140_s21 }
  0x3a   :  { %168 = vmatpush3.bf16.msra.mxu0 %v167_v5  ;;  %p248_p10 = scmp.ne.s32.totalorder %s140_s21, %s247_s22  ;;  %p253_p12 = scmp.lt.s32.totalorder %s247_s22, %s247_s22 }
  0x3b   :  { %169 = vmatprep.subr.bf16.mxu0 %v280_v0 }
  0x3c   :  { %p254_p13 = por %p253_p12, %p252_p11 }
  0x3e   :  { %171 = vmatpush3.bf16.msra.mxu0 %v170_v7  ;;  %p255_p0 = pnand %p254_p13, %p248_p10 }
  0x41   :  { %164 = vmatmul.mubr.msk.f32.vlgmr.msra.gmra.mrb[0].mxu0 %vm58_vm1, %v52_v8 }
 0x114   :  { %v128_v10 = vpop.f32.mrb[0].mxu0 }
 0x115   :  { %v129_v11 = vadd.f32 %v128_v10, %v57_v9  ;;  %v165_v12 = vpop.f32.mrb[1].mxu0 }
 0x117   :  { %132 = vst [vmem:[#allocation8] sm:$0xff] %v129_v11 }
 0x118   :  { %258 = shalt.err (!%p255_p0)
}
 0x119   :  { %s259_s25 = scalar_lea.hbm %s355_s3, 128 }
 0x11a   :  { %p260_p1 = scmp.ne.s32.totalorder %s355_s3, %s259_s25  ;;  %p263_p2 = scmp.lt.u32.totalorder %s259_s25, %s355_s3 }
 0x11c   :  { %p265_p3 = pnand %p263_p2, %p260_p1 }
 0x11e   :  { %268 = shalt.err (!%p265_p3)
}
 0x11f   :  { %142 = dma.vmem_to_hbm [thread:$0]  %s140_s21, 128, %s355_s3, [#allocation4]  }
 0x120   :  { %273 = dma.done.wait [#allocation4], 128  }
 0x121   :  { %274 = vsyncadd [#allocation4], 4294967168 }
 0x122   :  { %146 = vsyncpa [#allocation3], 1 }
 0x123   :  { %147 = vsyncpa [#allocation6], 1 }
 0x124   :  { %148 = vsyncpa [#allocation4], 1 }

</bundles_post_ra>
